<compile_context>
chip_gen: v5e
topology: v5e:2x2
jax: 0.10.0
libtpu: 0.0.40
codegen_flags: <defaults>
</compile_context>

<pallas_src>
from functools import partial

import jax
import jax.numpy as jnp
from jax.experimental import pallas as pl
from jax.experimental.pallas import tpu as pltpu


def _quantize_kernel(x_ref, s_ref, e_ref, o_ref, *, q_min, q_max):
    """Fake-quantize one (tm, D) row tile.

    x_ref : (tm, D) activations (input dtype).
    s_ref : (tm, G) per-(row, group) scales (f32), G = (D - keeper) / group_size.
    e_ref : (G, D)  0/1 group->lane expansion matrix (f32), VMEM-resident.
    o_ref : (tm, D) output (input dtype).

    Columns [0, keeper) pass through untouched (E has all-zero columns there,
    so the expanded reciprocal is exactly 0 and the select falls back to x).
    Column c >= keeper uses the scale of its group g = (c - keeper) // group_size.
    """
    x = x_ref[...]
    xf = x.astype(jnp.float32)
    s = s_ref[...].astype(jnp.float32)            # (tm, G) — tiny
    r = 1.0 / s                                   # exact reciprocal on grouped scales
    e = e_ref[...]                                # (G, D), resident across grid steps

    tm = x.shape[0]

    # Single exact lane-expansion on the MXU for both s and r: each output
    # column sums exactly one term equal to 1.0 * value, so the result is
    # bit-exact.  Keeper columns come out as 0.
    sr = jnp.concatenate([s, r], axis=0)          # (2*tm, G)
    sr_full = jnp.dot(sr, e, preferred_element_type=jnp.float32,
                      precision=jax.lax.Precision.HIGHEST)   # (2*tm, D)
    s_full = sr_full[:tm]
    r_full = sr_full[tm:]

    q = jnp.clip(jnp.round(xf * r_full), q_min, q_max) * s_full
    # r_full == 0 exactly on keeper columns (E is all-zero there) -> pass-through.
    o_ref[...] = jnp.where(r_full != 0.0, q, xf).astype(o_ref.dtype)


def _sublane(dtype):
    """Native second-minor tile for the dtype (8 for 4B, 16 for 2B, 32 for 1B)."""
    return {4: 8, 2: 16, 1: 32}.get(jnp.dtype(dtype).itemsize, 8)


def _pick_row_tile(n_rows, d, n_groups, dtype, vmem_budget_bytes, e_bytes):
    """Largest row tile whose pipeline buffers + f32 temporaries fit the budget."""
    itemsize = jnp.dtype(dtype).itemsize
    sub = _sublane(dtype)
    # Per row: double-buffered (tm, D) x-in and out tiles, double-buffered
    # (tm, G) scales, the stacked (2, G) matmul LHS, and ~5 full-width f32
    # temporaries (xf, s_full, r_full, q, select result).
    bytes_per_row = 2 * (2 * d * itemsize) + 4 * n_groups * 4 + 5 * d * 4
    budget = max(vmem_budget_bytes - 2 * e_bytes, bytes_per_row * sub)
    tm = int(budget // bytes_per_row)
    # Beyond ~512 rows the kernel is already at the HBM roofline; bigger tiles
    # only inflate temp pressure (matters most on v7x's 64 MiB VMEM).
    tm = max(sub, min(tm, 512))
    if tm >= n_rows:
        return n_rows                      # one block covering every row
    tm = (tm // sub) * sub
    # Keep >= 4 blocks when possible so both v7x TensorCores get >= 2 each.
    if pl.cdiv(n_rows, tm) < 4:
        tm4 = max(sub, (pl.cdiv(n_rows, 4) // sub) * sub)
        if tm4 < tm:
            tm = tm4
    return max(tm, sub)


def quantizer_forward(hidden_states, scales, *, static, keeper, act_group_size,
                      abits, a_sym=True, tm=None, vmem_budget_bytes=None):
    """JAX/Pallas equivalent of Quantizer.forward (static path)."""
    if (not static) or (scales is None):
        # TODO(synk): dynamic path (static=False) applies a user-provided
        # act_quant callable (identity by default); it is not a kernel.
        return hidden_states

    assert a_sym, "Only support statically symmetric quantization"
    saved_shape = hidden_states.shape
    D = saved_shape[-1]
    x2d = hidden_states.reshape(-1, D)
    N = x2d.shape[0]
    rest = D - keeper
    assert act_group_size == 0 or rest % act_group_size == 0, \
        "Group size should be divisible by (dim - keeper)."

    if act_group_size > 0:
        n_groups = rest // act_group_size
        group_size = act_group_size
    else:
        n_groups = 1
        group_size = rest
    assert scales.size == N * n_groups, \
        "Scales and selected states must have the same dimension"
    # Grouped scales only — never a full (N, D) map in HBM.
    s_grp = scales.reshape(N, n_groups).astype(jnp.float32)

    q_min = float(-2 ** (abits - 1))
    q_max = float(2 ** (abits - 1) - 1)

    # One-hot group -> lane expansion matrix, built once and kept VMEM-resident
    # (index_map always returns block (0, 0), so it is DMA'd a single time).
    col = jnp.arange(D, dtype=jnp.int32)[None, :]              # (1, D)
    grp = jnp.arange(n_groups, dtype=jnp.int32)[:, None]       # (G, 1)
    lo = keeper + grp * group_size
    e_mat = ((col >= lo) & (col < lo + group_size)).astype(jnp.float32)   # (G, D)
    e_bytes = n_groups * D * 4

    # Clamp everything to the device's physical VMEM (64 MiB/TC on v7x).
    try:
        cap = int(pltpu.get_tpu_info().vmem_capacity_bytes)
    except Exception:
        cap = 64 << 20                      # conservative fallback (v7x per-TC)
    if vmem_budget_bytes is None:
        vmem_budget_bytes = min(24 << 20, cap // 3)

    itemsize = jnp.dtype(x2d.dtype).itemsize
    sub = _sublane(x2d.dtype)
    if tm is None:
        tm = _pick_row_tile(N, D, n_groups, x2d.dtype, vmem_budget_bytes, e_bytes)
    else:
        tm = min(int(tm), N)
        if tm < N:
            tm = max(sub, (tm // sub) * sub)
    grid = (pl.cdiv(N, tm),)

    pipeline_bytes = 2 * (2 * tm * D * itemsize) + 2 * tm * n_groups * 4 + 2 * e_bytes
    temps_bytes = 5 * tm * D * 4 + 4 * tm * n_groups * 4
    vmem_limit = int(min(max(pipeline_bytes + temps_bytes + (8 << 20), 32 << 20),
                         cap - (8 << 20)))

    out2d = pl.pallas_call(
        partial(_quantize_kernel, q_min=q_min, q_max=q_max),
        out_shape=jax.ShapeDtypeStruct((N, D), x2d.dtype),
        grid_spec=pltpu.PrefetchScalarGridSpec(
            num_scalar_prefetch=0,
            grid=grid,
            in_specs=[
                pl.BlockSpec((tm, D), lambda i: (i, 0)),
                pl.BlockSpec((tm, n_groups), lambda i: (i, 0)),
                pl.BlockSpec((n_groups, D), lambda i: (0, 0)),   # resident
            ],
            out_specs=pl.BlockSpec((tm, D), lambda i: (i, 0)),
        ),
        input_output_aliases={0: 0},
        compiler_params=pltpu.CompilerParams(
            dimension_semantics=("parallel",),
            vmem_limit_bytes=vmem_limit),
    )(x2d, s_grp, e_mat)

    return out2d.reshape(saved_shape)


def quantizer_reference(hidden_states, scales, *, keeper, act_group_size, abits):
    """Pure-JAX replica of the PyTorch math, for verification."""
    saved_shape = hidden_states.shape
    D = saved_shape[-1]
    x2d = hidden_states.reshape(-1, D)
    sel = x2d[:, keeper:]
    if act_group_size > 0:
        sel = sel.reshape(-1, act_group_size)
    q_min = -2 ** (abits - 1)
    q_max = 2 ** (abits - 1) - 1
    sel = jnp.clip(jnp.round(sel / scales), q_min, q_max) * scales
    sel = sel.reshape(-1, D - keeper)
    x2d = x2d.at[:, keeper:].set(sel)
    return x2d.reshape(saved_shape)


if __name__ == "__main__":
    # Args mirrored from the PyTorch module's `args`:
    STATIC = True
    A_SYM = True
    KEEPER = 8
    ACT_GROUP_SIZE = 8
    ABITS = 8

    B, S, D = 2, 8, 32          # hidden_states: (batch, seq, hidden)
    N = B * S
    n_scales = N * (D - KEEPER) // ACT_GROUP_SIZE   # per-(token, group) scales

    key = jax.random.PRNGKey(0)
    kx, ks = jax.random.split(key)
    hidden_states = jax.random.normal(kx, (B, S, D), dtype=jnp.float32)
    # Per-group scales as exact powers of two (common in practice).  This makes
    # the kernel's multiply-by-exact-reciprocal bit-identical to the reference's
    # divide, so the comparison is deterministic while still exercising the
    # per-group scale expansion (scales vary across groups/tokens).
    # TODO(synk): for non-power-of-two scales, x * (1/s) can differ from x / s
    # by one quantization code at round-to-nearest ties.
    exps = jax.random.randint(ks, (n_scales, 1), minval=-5, maxval=-2)
    scales = jnp.ldexp(jnp.float32(1.0), exps).astype(jnp.float32)  # (n_scales, 1)

    out = quantizer_forward(
        hidden_states, scales,
        static=STATIC, keeper=KEEPER, act_group_size=ACT_GROUP_SIZE,
        abits=ABITS, a_sym=A_SYM)
    out = jax.block_until_ready(out)

    ref = quantizer_reference(
        hidden_states, scales,
        keeper=KEEPER, act_group_size=ACT_GROUP_SIZE, abits=ABITS)
    ref = jax.block_until_ready(ref)

    assert out.shape == hidden_states.shape
    assert jnp.allclose(out, ref, atol=1e-5, rtol=1e-5), "mismatch vs reference"
    # keeper columns must pass through untouched
    assert jnp.array_equal(out[..., :KEEPER], hidden_states[..., :KEEPER])

    print("KERNEL_OK")
</pallas_src>

<mosaic_0001>
module attributes {stable_mosaic.version = 11 : i64} {
  func.func @_quantize_kernel(%arg0: i32, %arg1: memref<16x32xf32, #tpu.memory_space<vmem>>, %arg2: memref<16x3xf32, #tpu.memory_space<vmem>>, %arg3: memref<3x32xf32, #tpu.memory_space<vmem>>, %arg4: memref<16x32xf32, #tpu.memory_space<vmem>>) attributes {dimension_semantics = [#tpu.dimension_semantics<parallel>], iteration_bounds = array<i64: 1>, scalar_prefetch = 0 : i64, scratch_operands = 0 : i64, tpu.core_type = #tpu.core_type<tc>, window_params = [{transform_indices = @transform_0, window_bounds = array<i64: 16, 32>}, {transform_indices = @transform_1, window_bounds = array<i64: 16, 3>}, {pipeline_mode = #tpu.pipeline_mode<synchronous>, transform_indices = @transform_2, window_bounds = array<i64: 3, 32>}, {transform_indices = @transform_3, window_bounds = array<i64: 16, 32>}]} {
    %c0 = arith.constant 0 : index
    %c0_0 = arith.constant 0 : index
    %0 = vector.load %arg1[%c0, %c0_0] : memref<16x32xf32, #tpu.memory_space<vmem>>, vector<16x32xf32>
    %c0_1 = arith.constant 0 : index
    %c0_2 = arith.constant 0 : index
    %1 = vector.load %arg2[%c0_1, %c0_2] : memref<16x3xf32, #tpu.memory_space<vmem>>, vector<16x3xf32>
    %cst = arith.constant 1.000000e+00 : f32
    %2 = vector.broadcast %cst : f32 to vector<16x3xf32>
    %3 = arith.divf %2, %1 : vector<16x3xf32>
    %c0_3 = arith.constant 0 : index
    %c0_4 = arith.constant 0 : index
    %4 = vector.load %arg3[%c0_3, %c0_4] : memref<3x32xf32, #tpu.memory_space<vmem>>, vector<3x32xf32>
    %5 = tpu.concatenate %1, %3 in 0 : vector<16x3xf32>, vector<16x3xf32> -> vector<32x3xf32>
    %cst_5 = arith.constant dense<0.000000e+00> : vector<32x32xf32>
    %6 = tpu.matmul %5, %4, %cst_5 {dimension_numbers = #tpu.dot_dimension_numbers<[1], [0], [0], [1], [0, 0, 1, 1], [], []>, precision = #tpu.contract_precision<fp32>} : vector<32x3xf32>, vector<3x32xf32>, vector<32x32xf32> -> vector<32x32xf32>
    %7 = vector.extract_strided_slice %6 {offsets = [0, 0], sizes = [16, 32], strides = [1, 1]} : vector<32x32xf32> to vector<16x32xf32>
    %8 = vector.extract_strided_slice %6 {offsets = [16, 0], sizes = [16, 32], strides = [1, 1]} : vector<32x32xf32> to vector<16x32xf32>
    %9 = arith.mulf %0, %8 : vector<16x32xf32>
    %10 = math.roundeven %9 : vector<16x32xf32>
    %cst_6 = arith.constant -1.280000e+02 : f32
    %cst_7 = arith.constant 1.270000e+02 : f32
    %11 = vector.broadcast %cst_6 : f32 to vector<16x32xf32>
    %12 = arith.maximumf %11, %10 : vector<16x32xf32>
    %13 = vector.broadcast %cst_7 : f32 to vector<16x32xf32>
    %14 = arith.minimumf %13, %12 : vector<16x32xf32>
    %15 = arith.mulf %14, %7 : vector<16x32xf32>
    %cst_8 = arith.constant 0.000000e+00 : f32
    %16 = vector.broadcast %cst_8 : f32 to vector<16x32xf32>
    %17 = arith.cmpf one, %8, %16 : vector<16x32xf32>
    %18 = arith.select %17, %15, %0 : vector<16x32xi1>, vector<16x32xf32>
    %c0_9 = arith.constant 0 : index
    %c0_10 = arith.constant 0 : index
    %19 = vector.load %arg4[%c0_9, %c0_10] : memref<16x32xf32, #tpu.memory_space<vmem>>, vector<16x32xf32>
    tpu.vector_store %arg4[%c0_9, %c0_10], %18 {strides = array<i32>} : memref<16x32xf32, #tpu.memory_space<vmem>>, vector<16x32xf32>,
    return
  }
  func.func @transform_0(%arg0: i32) -> (i32, i32) {
    %c0_i32 = arith.constant 0 : i32
    %c0_i32_0 = arith.constant 0 : i32
    return %arg0, %c0_i32 : i32, i32
  }
  func.func @transform_1(%arg0: i32) -> (i32, i32) {
    %c0_i32 = arith.constant 0 : i32
    %c0_i32_0 = arith.constant 0 : i32
    return %arg0, %c0_i32 : i32, i32
  }
  func.func @transform_2(%arg0: i32) -> (i32, i32) {
    %c0_i32 = arith.constant 0 : i32
    %c0_i32_0 = arith.constant 0 : i32
    %c0_i32_1 = arith.constant 0 : i32
    return %c0_i32, %c0_i32_0 : i32, i32
  }
  func.func @transform_3(%arg0: i32) -> (i32, i32) {
    %c0_i32 = arith.constant 0 : i32
    %c0_i32_0 = arith.constant 0 : i32
    return %arg0, %c0_i32 : i32, i32
  }
}

</mosaic_0001>

<bundles_post_ra>
// kernel: tpu_custom_call.1
= control target key start
LH: loop header
LB: loop body
LE: loop exit
PB: predicated region body
PF: predicated region fallthrough
CT: control target
= control target key end

     0   :  { %8 = vsyncpa [#allocation3], 0  ;;  %s517_s0 = inlined_call_operand.hbm [shape: f32[16,32], index: 0, kind: input, shape index: {}, may-alias: {0,3}]   ;;  %s518_s1 = inlined_call_operand.vmem [shape: f32[16,3], index: 1, kind: input, shape index: {}]   ;;  %s519_s2 = inlined_call_operand.vmem [shape: f32[3,32], index: 2, kind: input, shape index: {}]   ;;  %s520_s3 = inlined_call_operand.hbm [shape: f32[16,32], index: 3, kind: output, shape index: {}, may-alias: {0,3}]  }
   0x1   :  { %9 = vsyncpa [#allocation4], 0  ;;  %s14_s14 = sshll.u32 %s517_s0, 4  ;;  %s436_s15 = smov [#allocation2]   ;;  %s15_s14 = int_to_ptr.hbm [resolvable:$true] %s14_s14 }
   0x2   :  { %s16_s16 = sshll.u32 %s436_s15, 4  ;;  %s437_s17 = smov 128   ;;  %s17_s16 = int_to_ptr.vmem [resolvable:$true] %s16_s16 }
   0x3   :  { %s438_s18 = smov 8  }
   0x4   :  { %22 = dma.hbm_to_vmem [thread:$0]  %s15_s14, 256, %s17_s16, [#allocation3], %s437_s17, %s437_s17, %s438_s18  }
   0x5   :  { %432 = dma.done.wait [#allocation3], 256  }
   0x6   :  { %433 = vsyncadd [#allocation3], 4294967040  ;;  %vm79_vm0 = vcmask 1042432   ;;  %v65_v0 = vld [vmem:[%s519_s2] sm:$0x7]  ;;  %v34_v2 = vld [vmem:[%s518_s1 + $0x8] sm:$0xff] }
   0x7   :  { %v33_v1 = vld [vmem:[%s518_s1] sm:$0xff]  ;;  %v81_v3 = vsel %vm79_vm0, %v65_v0, 0  ;;  %vm66_vm1 = vcmask 23552   ;;  %v61_v21 = vand.u32 2147483648, %v34_v2  ;;  %vm55_vm4 = vweird.f32 %v34_v2  ;;  %s439_s1 = smov [#allocation5]   ;;  %s345_s26 = sshll.u32 %s520_s3, 4  ;;  %s346_s26 = int_to_ptr.hbm [resolvable:$true] %s345_s26 }
   0x8   :  { %380 = vrcp.f32 %v33_v1  ;;  %v98_v4 = vand.u32 4294901760, %v81_v3  ;;  %v68_v5 = vsel %vm66_vm1, %v33_v1, 0  ;;  %v71_v8 = vsel %vm66_vm1, %v34_v2, 0  ;;  %s343_s2 = sshll.u32 %s439_s1, 4  ;;  %s344_s2 = int_to_ptr.vmem [resolvable:$true] %s343_s2 }
   0x9   :  { %382 = vrcp.f32 %v34_v2  ;;  %v476_v7 = vand.u32 4294901760, %v68_v5  ;;  %v479_v9 = vand.u32 4294901760, %v71_v8  ;;  %vm40_vm2 = vweird.f32 %v33_v1 }
   0xa   :  { %358 = vmatpush.msra.mxu2 %v98_v4  ;;  %v149_v6 = vsub.f32 %v81_v3, %v98_v4  ;;  %99 = vmatpush.msra.mxu0 %v98_v4  ;;  %v44_v17 = vand.u32 2147483647, %v33_v1  ;;  %v46_v19 = vand.u32 2147483648, %v33_v1  ;;  %v59_v27 = vand.u32 2147483647, %v34_v2 }
   0xb   :  { %v482_v11 = vsub.f32 %v68_v5, %v476_v7  ;;  %v485_v13 = vsub.f32 %v71_v8, %v479_v9  ;;  %v62_v34 = vor.u32 1.1754944e-38, %v61_v21  ;;  %vm336_vm11 = vcmask 261120  }
   0xc   :  { %v150_v10 = vand.u32 4294901760, %v149_v6  ;;  %188 = vmatpush.msrb.mxu2 %v149_v6  ;;  %v47_v31 = vor.u32 1.1754944e-38, %v46_v19  ;;  %vm45_vm7 = vcmp.eq.f32.partialorder %v44_v17, 8.507059e+37  ;;  %vm60_vm9 = vcmp.eq.f32.partialorder %v59_v27, 8.507059e+37 }
   0xd   :  { %v102_v18 = vand.u32 4294901760, %v482_v11  ;;  %v110_v25 = vand.u32 4294901760, %v485_v13 }
   0xe   :  { %v381_v12 = vpop.eup %380  ;;  %v151_v15 = vsub.f32 %v149_v6, %v150_v10  ;;  %270 = vmatpush.msrb.mxu0 %v150_v10 }
   0xf   :  { %v383_v14 = vpop.eup %382  ;;  %v36_v16 = vmul.f32 %v381_v12, %v33_v1  ;;  %vm41_vm3 = vweird.f32 %v381_v12  ;;  %v103_v24 = vsub.f32 %v482_v11, %v102_v18  ;;  %v111_v35 = vsub.f32 %v485_v13, %v110_v25 }
  0x10   :  { %v51_v20 = vmul.f32 %v383_v14, %v34_v2  ;;  %v152_v22 = vand.u32 4294901760, %v151_v15  ;;  %vm56_vm5 = vweird.f32 %v383_v14  ;;  %vm492_vm6 = vmor %vm40_vm2, %vm41_vm3 }
  0x11   :  { %v37_v23 = vsub.f32 1.0, %v36_v16  ;;  %v104_v29 = vand.u32 4294901760, %v103_v24  ;;  %vm57_vm8 = vmor %vm55_vm4, %vm56_vm5  ;;  %v112_v42 = vand.u32 4294901760, %v111_v35 }
  0x12   :  { %v52_v26 = vsub.f32 1.0, %v51_v20  ;;  %359 = vmatpush.msra.mxu3 %v152_v22  ;;  %153 = vmatpush.msra.mxu1 %v152_v22 }
  0x13   :  { %v38_v28 = vmul.f32 %v381_v12, %v37_v23  ;;  %155 = vmatmul.f32.vlgmr.msra.gmra.mxu1 %v476_v7  ;;  %105 = vmatmul.f32.vlgmr.msra.gmra.mxu0 %v104_v29 }
  0x14   :  { %226 = vmatpush.msrb.mxu3 %v98_v4  ;;  %v53_v32 = vmul.f32 %v383_v14, %v52_v26  ;;  %304 = vmatpush.msrb.mxu1 %v98_v4 }
  0x15   :  { %v39_v33 = vadd.f32 %v381_v12, %v38_v28 }
  0x16   :  { %v54_v36 = vadd.f32 %v383_v14, %v53_v32 }
  0x17   :  { %v43_v37 = vsel %vm492_vm6, %v381_v12, %v39_v33 }
  0x18   :  { %v48_v38 = vsel %vm45_vm7, %v47_v31, %v43_v37  ;;  %v58_v39 = vsel %vm57_vm8, %v383_v14, %v54_v36  ;;  %v31_v14 = vld [vmem:[#allocation2] sm:$0xff]  ;;  %v32_v31 = vld [vmem:[#allocation2 + $0x8] sm:$0xff] }
  0x19   :  { %v74_v40 = vsel %vm66_vm1, %v48_v38, 0  ;;  %v63_v41 = vsel %vm60_vm9, %v62_v34, %v58_v39 }
  0x1a   :  { %v116_v43 = vand.u32 4294901760, %v74_v40  ;;  %v77_v44 = vsel %vm66_vm1, %v63_v41, 0 }
  0x1b   :  { %v124_v45 = vand.u32 4294901760, %v77_v44  ;;  %159 = vmatmul.f32.gmra.mxu1 %v479_v9  ;;  %113 = vmatmul.f32.gmra.mxu0 %v112_v42 }
  0x1c   :  { %v117_v46 = vsub.f32 %v74_v40, %v116_v43  ;;  %163 = vmatmul.f32.vlgmr.msra.gmra.mxu3 %v116_v43 }
  0x1d   :  { %v125_v47 = vsub.f32 %v77_v44, %v124_v45 }
  0x1e   :  { %v118_v48 = vand.u32 4294901760, %v117_v46 }
  0x1f   :  { %v126_v50 = vand.u32 4294901760, %v125_v47 }
  0x20   :  { %v119_v49 = vsub.f32 %v117_v46, %v118_v48 }
  0x21   :  { %v127_v52 = vsub.f32 %v125_v47, %v126_v50 }
  0x22   :  { %v120_v51 = vand.u32 4294901760, %v119_v49 }
  0x23   :  { %272 = vmatmul.f32.vlgmr.msrb.gmra.mxu0 %v476_v7  ;;  %306 = vmatmul.f32.vlgmr.msrb.gmra.mxu1 %v476_v7  ;;  %v128_v53 = vand.u32 4294901760, %v127_v52 }
  0x24   :  { %121 = vmatmul.f32.vlgmr.msra.gmra.mxu2 %v120_v51  ;;  %167 = vmatmul.f32.gmra.mxu3 %v124_v45 }
  0x2b   :  { %276 = vmatmul.f32.gmra.mxu0 %v479_v9  ;;  %310 = vmatmul.f32.gmra.mxu1 %v479_v9 }
  0x2c   :  { %129 = vmatmul.f32.gmra.mxu2 %v128_v53  ;;  %230 = vmatmul.f32.vlgmr.msrb.gmra.mxu3 %v102_v18 }
  0x33   :  { %280 = vmatmul.f32.gmra.mxu0 %v116_v43  ;;  %314 = vmatmul.f32.gmra.mxu1 %v116_v43 }
  0x34   :  { %191 = vmatmul.f32.vlgmr.msrb.gmra.mxu2 %v482_v11  ;;  %236 = vmatmul.f32.gmra.mxu3 %v110_v25 }
  0x3b   :  { %284 = vmatmul.f32.gmra.mxu0 %v124_v45  ;;  %318 = vmatmul.f32.gmra.mxu1 %v124_v45 }
  0x3c   :  { %196 = vmatmul.f32.gmra.mxu2 %v485_v13  ;;  %242 = vmatmul.f32.gmra.mxu3 %v118_v48 }
  0x44   :  { %201 = vmatmul.f32.gmra.mxu2 %v117_v46  ;;  %248 = vmatmul.f32.gmra.mxu3 %v126_v50 }
  0x4c   :  { %206 = vmatmul.f32.gmra.mxu2 %v125_v47 }
  0x90   :  { %v106_v55 = vpop.f32.mrf.mxu0  ;;  %v156_v56 = vpop.f32.mrf.mxu1 }
  0x91   :  { %v157_v17 = vadd.f32 %v156_v56, %v106_v55 }
  0x98   :  { %v114_v59 = vpop.f32.mrf.mxu0  ;;  %v160_v60 = vpop.f32.mrf.mxu1 }
  0x99   :  { %v161_v35 = vadd.f32 %v160_v60, %v114_v59 }
  0x9f   :  { %v164_v54 = vpop.f32.mrf.mxu3 }
  0xa0   :  { %v273_v63 = vpop.f32.mrf.mxu0  ;;  %v307_v0 = vpop.f32.mrf.mxu1 }
  0xa7   :  { %v122_v57 = vpop.f32.mrf.mxu2  ;;  %v168_v58 = vpop.f32.mrf.mxu3 }
  0xa8   :  { %v277_v3 = vpop.f32.mrf.mxu0  ;;  %v311_v5 = vpop.f32.mrf.mxu1  ;;  %v165_v7 = vadd.f32 %v164_v54, %v122_v57 }
  0xaf   :  { %v130_v61 = vpop.f32.mrf.mxu2  ;;  %v231_v62 = vpop.f32.mrf.mxu3 }
  0xb0   :  { %v281_v9 = vpop.f32.mrf.mxu0  ;;  %v315_v11 = vpop.f32.mrf.mxu1  ;;  %v169_v15 = vadd.f32 %v168_v58, %v130_v61 }
  0xb7   :  { %v192_v1 = vpop.f32.mrf.mxu2  ;;  %v237_v2 = vpop.f32.mrf.mxu3 }
  0xb8   :  { %v193_v22 = vadd.f32 %v192_v1, %v157_v17  ;;  %v285_v23 = vpop.f32.mrf.mxu0  ;;  %v319_v26 = vpop.f32.mrf.mxu1 }
  0xba   :  { %v232_v29 = vadd.f32 %v231_v62, %v193_v22 }
  0xbc   :  { %v274_v38 = vadd.f32 %v273_v63, %v232_v29 }
  0xbe   :  { %v308_v44 = vadd.f32 %v307_v0, %v274_v38 }
  0xbf   :  { %v197_v4 = vpop.f32.mrf.mxu2  ;;  %v243_v6 = vpop.f32.mrf.mxu3 }
  0xc0   :  { %v198_v39 = vadd.f32 %v197_v4, %v161_v35 }
  0xc2   :  { %v238_v45 = vadd.f32 %v237_v2, %v198_v39 }
  0xc4   :  { %v278_v52 = vadd.f32 %v277_v3, %v238_v45 }
  0xc6   :  { %v312_v56 = vadd.f32 %v311_v5, %v278_v52 }
  0xc7   :  { %v202_v8 = vpop.f32.mrf.mxu2  ;;  %v249_v19 = vpop.f32.mrf.mxu3 }
  0xc8   :  { %v203_v10 = vadd.f32 %v202_v8, %v165_v7 }
  0xca   :  { %v244_v12 = vadd.f32 %v243_v6, %v203_v10 }
  0xcc   :  { %v282_v13 = vadd.f32 %v281_v9, %v244_v12 }
  0xce   :  { %v316_v16 = vadd.f32 %v315_v11, %v282_v13 }
  0xcf   :  { %v207_v18 = vpop.f32.mrf.mxu2 }
  0xd0   :  { %v322_v20 = vmul.f32 %v316_v16, %v31_v14  ;;  %v208_v21 = vadd.f32 %v207_v18, %v169_v15  ;;  %vm332_vm12 = vcmp.ne.f32.partialorder %v316_v16, 0.0 }
  0xd2   :  { %v362_v24 = vcvt.f32.s32 %v322_v20  ;;  %v250_v25 = vadd.f32 %v249_v19, %v208_v21  ;;  %v360_v30 = vand.u32 2147483647, %v322_v20  ;;  %v365_v33 = vand.u32 2147483648, %v322_v20 }
  0xd4   :  { %v363_v27 = vcvt.s32.f32 %v362_v24  ;;  %v286_v28 = vadd.f32 %v285_v23, %v250_v25  ;;  %vm361_vm10 = vcmp.lt.f32.partialorder %v360_v30, 8388608.0 }
  0xd6   :  { %v364_v32 = vand.u32 2147483647, %v363_v27  ;;  %v320_v34 = vadd.f32 %v319_v26, %v286_v28 }
  0xd8   :  { %v366_v36 = vor.u32 %v365_v33, %v364_v32  ;;  %v323_v37 = vmul.f32 %v320_v34, %v32_v31  ;;  %vm333_vm14 = vcmp.ne.f32.partialorder %v320_v34, 0.0 }
  0xda   :  { %v367_v40 = vsel %vm361_vm10, %v366_v36, %v322_v20  ;;  %v370_v41 = vcvt.f32.s32 %v323_v37  ;;  %v368_v47 = vand.u32 2147483647, %v323_v37  ;;  %v373_v49 = vand.u32 2147483648, %v323_v37 }
  0xdb   :  { %v326_v42 = vmax.f32 %v367_v40, -128.0 }
  0xdc   :  { %v371_v43 = vcvt.s32.f32 %v370_v41  ;;  %vm369_vm13 = vcmp.lt.f32.partialorder %v368_v47, 8388608.0 }
  0xdd   :  { %v328_v46 = vmin.f32 %v326_v42, 127.0 }
  0xde   :  { %v372_v48 = vand.u32 2147483647, %v371_v43 }
  0xdf   :  { %v330_v50 = vmul.f32 %v328_v46, %v308_v44 }
  0xe0   :  { %v374_v51 = vor.u32 %v373_v49, %v372_v48 }
  0xe1   :  { %v334_v53 = vsel %vm332_vm12, %v330_v50, %v31_v14 }
  0xe2   :  { %v375_v54 = vsel %vm369_vm13, %v374_v51, %v323_v37  ;;  %337 = vst.msk [vmem:[#allocation5] sm:$0xff] %vm336_vm11, %v334_v53 }
  0xe3   :  { %v327_v55 = vmax.f32 %v375_v54, -128.0 }
  0xe5   :  { %v329_v57 = vmin.f32 %v327_v55, 127.0 }
  0xe7   :  { %v331_v58 = vmul.f32 %v329_v57, %v312_v56 }
  0xe9   :  { %v335_v59 = vsel %vm333_vm14, %v331_v58, %v32_v31 }
  0xea   :  { %338 = vst.msk [vmem:[#allocation5 + $0x8] sm:$0xff] %vm336_vm11, %v335_v59 }
  0xeb   :  { %351 = dma.vmem_to_hbm [thread:$0]  %s344_s2, 256, %s346_s26, [#allocation4], %s437_s17, %s437_s17, %s438_s18  }
  0xec   :  { %434 = dma.done.wait [#allocation4], 256  }
  0xed   :  { %435 = vsyncadd [#allocation4], 4294967040 }
  0xee   :  { %356 = vsyncpa [#allocation3], 1 }
  0xef   :  { %357 = vsyncpa [#allocation4], 1 }

</bundles_post_ra>
